<compile_context>
chip_gen: v6e
topology: v6e:2x2x1
jax: 0.10.0
libtpu: 0.0.40
codegen_flags: <defaults>
</compile_context>

<pallas_src>
import jax
import jax.numpy as jnp
from jax.experimental import pallas as pl
from jax.experimental.pallas import tpu as pltpu


def _round_up(a, b):
    return (a + b - 1) // b * b


def _conv_lrelu_kernel(p_ref, w_ref, o_ref):
    # p_ref: (1, TM, TK) bf16   w_ref: (1, TK, COGP) bf16   o_ref: (1, TM, COGP) f32
    #
    # NOTE: the output BlockSpec's index_map ignores grid axis 2 (K), so this f32
    # block stays resident in VMEM across the whole K reduction and doubles as
    # the accumulator.  K MUST remain the LAST grid axis and be "arbitrary";
    # reordering the grid would silently break the accumulation.
    @pl.when(pl.program_id(2) == 0)
    def _init():
        o_ref[...] = jnp.zeros_like(o_ref)

    o_ref[0] += jnp.dot(p_ref[0], w_ref[0], preferred_element_type=jnp.float32)

    @pl.when(pl.program_id(2) == pl.num_programs(2) - 1)
    def _finalize():
        a = o_ref[...]
        o_ref[...] = jnp.where(a > 0, a, 0.1 * a)   # LeakyReLU(0.1) on f32 acc


def cnn_block_forward(x_nchw, weight, *, stride, padding, groups,
                      block_m=512, block_k=2048,
                      compute_dtype=jnp.bfloat16):
    """Conv2d(bias=False, groups=groups) + LeakyReLU(0.1), matching PyTorch.

    x_nchw : (N, Cin, H, W) float32
    weight : (Cout, Cin//groups, kh, kw) float32   (PyTorch OIHW layout)
    """
    N, Cin, H, W = x_nchw.shape
    Cout, Cg, kh, kw = weight.shape
    assert Cin == Cg * groups
    assert Cout % groups == 0
    Cog = Cout // groups

    Ho = (H + 2 * padding - kh) // stride + 1
    Wo = (W + 2 * padding - kw) // stride + 1
    M = N * Ho * Wo
    Kg = kh * kw * Cg
    cog_pad = _round_up(Cog, 128)            # lane-dense output / full MXU N width

    # ---- generation-aware VMEM budget (v5e/v6e: 128 MiB, v7x: 64 MiB) --------
    try:
        vmem_cap = int(pltpu.get_tpu_info().vmem_capacity_bytes)
    except Exception:
        vmem_cap = 64 * 1024 * 1024          # conservative (v7x-safe) fallback
    budget = max(16 * 1024 * 1024,
                 min(vmem_cap - 16 * 1024 * 1024, (3 * vmem_cap) // 4))

    itemsize = jnp.dtype(compute_dtype).itemsize

    def vmem_bytes(tm_, tk_):
        # double-buffered bf16 inputs + double-buffered resident f32 output/acc
        return (2 * (tm_ * tk_ + tk_ * cog_pad) * itemsize
                + 2 * tm_ * cog_pad * 4)

    # ---- tile sizes: prefer a single K tile so weights stay resident ---------
    tm = min(_round_up(block_m, 16), _round_up(M, 16))     # bf16 packs 16 rows
    if Kg <= block_k and vmem_bytes(16, Kg) <= budget:
        tk, k_pad = Kg, Kg                   # one K tile, full (unpadded) dim
    else:
        tk = _round_up(min(block_k, Kg), 128)
        while tk > 128 and vmem_bytes(16, tk) > budget:
            tk = _round_up(tk // 2, 128)
        k_pad = _round_up(Kg, tk)
    while tm > 16 and vmem_bytes(tm, tk) > budget:          # re-tile, don't clamp
        tm = _round_up(tm // 2, 16)
    m_pad = _round_up(M, tm)
    m_tiles = m_pad // tm
    # keep both v7x TensorCores busy: need >= 2 blocks on the parallel axes
    if groups * m_tiles < 2 and M > 16:
        tm = _round_up(pl.cdiv(M, 2), 16)
        m_pad = _round_up(M, tm)
        m_tiles = m_pad // tm
    k_tiles = k_pad // tk

    # ---- im2col, built per group directly in bf16 (early cast) ---------------
    x = jnp.transpose(x_nchw, (0, 2, 3, 1)).astype(compute_dtype)   # NHWC, bf16
    x = jnp.pad(x, ((0, 0), (padding, padding), (padding, padding), (0, 0)))

    per_group = []
    for g in range(groups):
        xg = x[..., g * Cg:(g + 1) * Cg]
        cols = [xg[:, i:i + Ho * stride:stride, j:j + Wo * stride:stride, :]
                for i in range(kh) for j in range(kw)]
        # K ordered (kernel_i, kernel_j, channel-in-group)
        per_group.append(jnp.concatenate(cols, axis=-1).reshape(M, Kg))
    patches = jnp.stack(per_group, axis=0)                           # (G, M, Kg)
    patches = jnp.pad(patches, ((0, 0), (0, m_pad - M), (0, k_pad - Kg)))

    # ---- weight: (Cout, Cg, kh, kw) -> (G, Kg, Cog_pad), K ordered (i, j, c) --
    wg = weight.reshape(groups, Cog, Cg, kh, kw)
    wg = jnp.transpose(wg, (0, 3, 4, 2, 1)).reshape(groups, Kg, Cog)
    wg = jnp.pad(wg, ((0, 0), (0, k_pad - Kg), (0, cog_pad - Cog)))
    wg = wg.astype(compute_dtype)

    flops = 2 * groups * m_pad * k_pad * cog_pad
    bytes_accessed = int(patches.size * itemsize + wg.size * itemsize
                         + groups * m_pad * cog_pad * 4)

    out = pl.pallas_call(
        _conv_lrelu_kernel,
        out_shape=jax.ShapeDtypeStruct((groups, m_pad, cog_pad), jnp.float32),
        grid_spec=pltpu.PrefetchScalarGridSpec(
            num_scalar_prefetch=0,
            grid=(groups, m_tiles, k_tiles),
            in_specs=[
                pl.BlockSpec((1, tm, tk), lambda g, m, k: (g, m, k)),
                # weight block index ignores m -> resident across M tiles
                pl.BlockSpec((1, tk, cog_pad), lambda g, m, k: (g, k, 0)),
            ],
            # output index ignores k -> block is the K-axis accumulator (see kernel)
            out_specs=pl.BlockSpec((1, tm, cog_pad), lambda g, m, k: (g, m, 0)),
        ),
        compiler_params=pltpu.CompilerParams(
            dimension_semantics=("parallel", "parallel", "arbitrary"),
            vmem_limit_bytes=int(budget),
        ),
        cost_estimate=pl.CostEstimate(flops=flops, transcendentals=0,
                                      bytes_accessed=bytes_accessed),
    )(patches, wg)

    # (G, M_pad, Cog_pad) -> (N, Cout, Ho, Wo), group-major channels (PyTorch order)
    out = out[:, :M, :Cog]
    out = out.reshape(groups, N, Ho, Wo, Cog)
    out = jnp.transpose(out, (1, 0, 4, 2, 3))        # (N, G, Cog, Ho, Wo)
    return out.reshape(N, Cout, Ho, Wo)


def _reference(x, weight, *, stride, padding, groups):
    y = jax.lax.conv_general_dilated(
        x, weight,
        window_strides=(stride, stride),
        padding=[(padding, padding), (padding, padding)],
        dimension_numbers=("NCHW", "OIHW", "NCHW"),
        feature_group_count=groups,
    )
    return jnp.where(y > 0, y, 0.1 * y)


if __name__ == "__main__":
    key = jax.random.PRNGKey(0)
    k1, k2, k3, k4 = jax.random.split(key, 4)

    # Case 1: spec shapes — grouped conv, stride 1 (tiny per-group dims).
    x1 = jax.random.normal(k1, (2, 4, 16, 16), dtype=jnp.float32)
    w1 = jax.random.normal(k2, (8, 2, 3, 3), dtype=jnp.float32) * 0.1
    y1 = cnn_block_forward(x1, w1, stride=1, padding=1, groups=2)
    jax.block_until_ready(y1)
    r1 = _reference(x1, w1, stride=1, padding=1, groups=2)
    assert y1.shape == r1.shape
    assert jnp.allclose(y1, r1, atol=5e-2, rtol=5e-2), \
        float(jnp.max(jnp.abs(y1 - r1)))

    # Case 2: groups=1, stride 2 — single K tile, M split for megacore.
    x2 = jax.random.normal(k3, (2, 32, 16, 16), dtype=jnp.float32)
    w2 = jax.random.normal(k4, (64, 32, 3, 3), dtype=jnp.float32) * 0.1
    y2 = cnn_block_forward(x2, w2, stride=2, padding=1, groups=1)
    jax.block_until_ready(y2)
    r2 = _reference(x2, w2, stride=2, padding=1, groups=1)
    assert y2.shape == r2.shape
    assert jnp.allclose(y2, r2, atol=5e-2, rtol=5e-2), \
        float(jnp.max(jnp.abs(y2 - r2)))

    # Case 3: same op, forced small tiles — exercises the K-reduction
    # (accumulate-into-resident-output) path with k_tiles > 1.
    y3 = cnn_block_forward(x2, w2, stride=2, padding=1, groups=1,
                           block_m=64, block_k=128)
    jax.block_until_ready(y3)
    assert jnp.allclose(y3, r2, atol=5e-2, rtol=5e-2), \
        float(jnp.max(jnp.abs(y3 - r2)))

    print("KERNEL_OK")
</pallas_src>

<mosaic_0001>
module attributes {stable_mosaic.version = 11 : i64} {
  func.func @_conv_lrelu_kernel(%arg0: i32, %arg1: i32, %arg2: i32, %arg3: memref<1x512x18xbf16, #tpu.memory_space<vmem>>, %arg4: memref<1x18x128xbf16, #tpu.memory_space<vmem>>, %arg5: memref<1x512x128xf32, #tpu.memory_space<vmem>>) attributes {dimension_semantics = [#tpu.dimension_semantics<parallel>, #tpu.dimension_semantics<parallel>, #tpu.dimension_semantics<arbitrary>], iteration_bounds = array<i64: 2, 1, 1>, scalar_prefetch = 0 : i64, scratch_operands = 0 : i64, tpu.core_type = #tpu.core_type<tc>, window_params = [{transform_indices = @transform_0, window_bounds = array<i64: 1, 512, 18>}, {transform_indices = @transform_1, window_bounds = array<i64: 1, 18, 128>}, {transform_indices = @transform_2, window_bounds = array<i64: 1, 512, 128>}]} {
    %c0_i32 = arith.constant 0 : i32
    %0 = arith.cmpi eq, %arg2, %c0_i32 : i32
    %1 = arith.extui %0 : i1 to i32
    %c0_i32_0 = arith.constant 0 : i32
    %2 = arith.cmpi ne, %1, %c0_i32_0 : i32
    scf.if %2 {
      %cst_14 = arith.constant 0.000000e+00 : f32
      %17 = vector.broadcast %cst_14 : f32 to vector<1x512x128xf32>
      %c0_15 = arith.constant 0 : index
      %c0_16 = arith.constant 0 : index
      %c0_17 = arith.constant 0 : index
      %18 = vector.load %arg5[%c0_15, %c0_16, %c0_17] : memref<1x512x128xf32, #tpu.memory_space<vmem>>, vector<1x512x128xf32>
      tpu.vector_store %arg5[%c0_15, %c0_16, %c0_17], %17 {strides = array<i32>} : memref<1x512x128xf32, #tpu.memory_space<vmem>>, vector<1x512x128xf32>,
    } else {
    }
    %c0 = arith.constant 0 : index
    %c0_1 = arith.constant 0 : index
    %c0_2 = arith.constant 0 : index
    %3 = vector.load %arg5[%c0, %c0_1, %c0_2] : memref<1x512x128xf32, #tpu.memory_space<vmem>>, vector<1x512x128xf32>
    %4 = vector.shape_cast %3 : vector<1x512x128xf32> to vector<512x128xf32>
    %c0_3 = arith.constant 0 : index
    %c0_4 = arith.constant 0 : index
    %c0_5 = arith.constant 0 : index
    %5 = vector.load %arg3[%c0_3, %c0_4, %c0_5] : memref<1x512x18xbf16, #tpu.memory_space<vmem>>, vector<1x512x18xbf16>
    %6 = vector.shape_cast %5 : vector<1x512x18xbf16> to vector<512x18xbf16>
    %c0_6 = arith.constant 0 : index
    %c0_7 = arith.constant 0 : index
    %c0_8 = arith.constant 0 : index
    %7 = vector.load %arg4[%c0_6, %c0_7, %c0_8] : memref<1x18x128xbf16, #tpu.memory_space<vmem>>, vector<1x18x128xbf16>
    %8 = vector.shape_cast %7 : vector<1x18x128xbf16> to vector<18x128xbf16>
    %cst = arith.constant dense<0.000000e+00> : vector<512x128xf32>
    %9 = tpu.matmul %6, %8, %cst {dimension_numbers = #tpu.dot_dimension_numbers<[1], [0], [0], [1], [0, 0, 1, 1], [], []>} : vector<512x18xbf16>, vector<18x128xbf16>, vector<512x128xf32> -> vector<512x128xf32>
    %10 = arith.addf %4, %9 : vector<512x128xf32>
    %c0_9 = arith.constant 0 : index
    %c0_10 = arith.constant 0 : index
    %c0_11 = arith.constant 0 : index
    %11 = vector.load %arg5[%c0_9, %c0_10, %c0_11] : memref<1x512x128xf32, #tpu.memory_space<vmem>>, vector<1x512x128xf32>
    %12 = vector.shape_cast %11 : vector<1x512x128xf32> to vector<512x128xf32>
    %13 = vector.shape_cast %10 : vector<512x128xf32> to vector<1x512x128xf32>
    tpu.vector_store %arg5[%c0_9, %c0_10, %c0_11], %13 {strides = array<i32>} : memref<1x512x128xf32, #tpu.memory_space<vmem>>, vector<1x512x128xf32>,
    %c0_i32_12 = arith.constant 0 : i32
    %14 = arith.cmpi eq, %arg2, %c0_i32_12 : i32
    %15 = arith.extui %14 : i1 to i32
    %c0_i32_13 = arith.constant 0 : i32
    %16 = arith.cmpi ne, %15, %c0_i32_13 : i32
    scf.if %16 {
      %c0_14 = arith.constant 0 : index
      %c0_15 = arith.constant 0 : index
      %c0_16 = arith.constant 0 : index
      %17 = vector.load %arg5[%c0_14, %c0_15, %c0_16] : memref<1x512x128xf32, #tpu.memory_space<vmem>>, vector<1x512x128xf32>
      %cst_17 = arith.constant 0.000000e+00 : f32
      %18 = vector.broadcast %cst_17 : f32 to vector<1x512x128xf32>
      %19 = arith.cmpf ogt, %17, %18 : vector<1x512x128xf32>
      %cst_18 = arith.constant 1.000000e-01 : f32
      %20 = vector.broadcast %cst_18 : f32 to vector<1x512x128xf32>
      %21 = arith.mulf %20, %17 : vector<1x512x128xf32>
      %22 = arith.select %19, %17, %21 : vector<1x512x128xi1>, vector<1x512x128xf32>
      %c0_19 = arith.constant 0 : index
      %c0_20 = arith.constant 0 : index
      %c0_21 = arith.constant 0 : index
      %23 = vector.load %arg5[%c0_19, %c0_20, %c0_21] : memref<1x512x128xf32, #tpu.memory_space<vmem>>, vector<1x512x128xf32>
      tpu.vector_store %arg5[%c0_19, %c0_20, %c0_21], %22 {strides = array<i32>} : memref<1x512x128xf32, #tpu.memory_space<vmem>>, vector<1x512x128xf32>,
    } else {
    }
    return
  }
  func.func @transform_0(%arg0: i32, %arg1: i32, %arg2: i32) -> (i32, i32, i32) {
    %c0_i32 = arith.constant 0 : i32
    return %arg0, %arg1, %arg2 : i32, i32, i32
  }
  func.func @transform_1(%arg0: i32, %arg1: i32, %arg2: i32) -> (i32, i32, i32) {
    %c0_i32 = arith.constant 0 : i32
    %c0_i32_0 = arith.constant 0 : i32
    return %arg0, %arg2, %c0_i32 : i32, i32, i32
  }
  func.func @transform_2(%arg0: i32, %arg1: i32, %arg2: i32) -> (i32, i32, i32) {
    %c0_i32 = arith.constant 0 : i32
    %c0_i32_0 = arith.constant 0 : i32
    return %arg0, %arg1, %c0_i32 : i32, i32, i32
  }
}

</mosaic_0001>

<bundles_post_ra>
// kernel: tpu_custom_call.1
= control target key start
LH: loop header
LB: loop body
LE: loop exit
PB: predicated region body
PF: predicated region fallthrough
CT: control target
= control target key end

     0   :  { %7 = vsyncpa [#allocation3], 0  ;;  %s2189_s0 = inlined_call_operand.vmem [shape: bf16[2,512,18], index: 0, kind: input, shape index: {}]   ;;  %s2190_s1 = inlined_call_operand.vmem [shape: bf16[2,18,128], index: 1, kind: input, shape index: {}]   ;;  %s2191_s2 = inlined_call_operand.hbm [shape: f32[2,512,128], index: 2, kind: output, shape index: {}]  }
   0x1   :  { %9 = vsyncpa [#allocation3 + $0x1], 0  ;;  %s1935_s9 = smov 0   ;;  %s1937_s10 = smov 0  }
   0x2   :  { %s1939_s11 = smov 0   ;;  %s1941_s12 = smov 0  }
   0x3   :  { %s1943_s13 = smov 0   ;;  %s1945_s14 = smov 0  }
   0x4 LB: > { %s1556_s15 = sadd.s32 4294967295, %s1915_s14   ;;  %s1557_s16 = sadd.s32 4294967294, %s1915_s14   ;;  %s1915_s14 = sphi %s1945_s14, %s15_s14   ;;  %s1911_s13 = sphi %s1943_s13, %s2198_s13   ;;  %s1907_s12 = sphi %s1941_s12, %s2197_s12   ;;  %s1903_s11 = sphi %s1939_s11, %s2196_s11   ;;  %s1899_s10 = sphi %s1937_s10, %s2195_s10   ;;  %s1895_s9 = sphi %s1935_s9, %s2194_s9  }
   0x5   : > { %s34_s17 = sadd.s32 1, %s1911_s13  ;;  %s101_s18 = sadd.s32 1, %s1903_s11 }
   0x6   : > { %p36_p0 = scmp.ge.s32.totalorder %s34_s17, 2  ;;  %p111_p1 = scmp.ne.s32.totalorder %s1903_s11, %s1899_s10 }
   0x7   : > { %p112_p2 = scmp.eq.s32.totalorder %s1556_s15, 1  ;;  %p117_p3 = scmp.ne.s32.totalorder %s1899_s10, %s1895_s9 }
   0x8   : > { %s2200_s17 = smov (%p36_p0, %s34_s17), 0  ;;  %p118_p5 = scmp.eq.s32.totalorder %s1557_s16, 1 }
   0x9   : > { %p1975_p4 = por %p112_p2, %p111_p1  ;;  %s96_s20 = ssub.s32 %s1911_s13, %s2200_s17 }
   0xa   : > { %p1560_p6 = scmp.ge.s32.totalorder %s1915_s14, 1  ;;  %p99_p7 = scmp.eq.s32.totalorder %s96_s20, 0 }
   0xb   : > { %p1982_p8 = por %p118_p5, %p117_p3  ;;  %p165_p9 = scmp.lt.s32.totalorder %s1915_s14, 3 }
   0xc   : > { %s1988_s22 = scalar_select %p99_p7, %s1903_s11, %s101_s18  }
   0xd   : > { %p166_p10 = pnand %p1560_p6, %p165_p9 }
   0xe   : > { %p204_p11 = scmp.lt.s32.totalorder (!%p166_p10), %s1907_s12, 1  ;;  %s200_s4 = sand.u32 (!%p166_p10), 1, %s1899_s10  }
   0xf   : > { %169 = sbr.rel (%p166_p10) target bundleno = 307 (0x133), region = 28  ;;  %s1561_s5 = sshll.u32 (!%p166_p10), %s200_s4, 9 }
  0x10   : > { %s2067_s6 = scalar_lea.vmem (!%p166_p10), [#allocation2], %s1561_s5  ;;  %s1637_s7 = sshll.u32 (!%p166_p10), %s1907_s12, 13 }
  0x11   : > { %s1453_s8 = sshll.u32 (!%p166_p10), %s2067_s6, 4  ;;  %s2136_s16 = scalar_lea.hbm (!%p166_p10), %s2191_s2, %s1637_s7  ;;  %s2138_s8 = int_to_ptr.vmem [resolvable:$true] %s1453_s8 }
  0x12   : > { %s2144_s18 = scalar_lea.sflag (!%p166_p10), [#allocation3], %s200_s4  ;;  %s1839_s20 = scalar_lea.vmem (!%p166_p10), %s2138_s8, 8192 }
  0x13   : > { %p1840_p12 = scmp.ne.s32.totalorder (!%p166_p10), %s2138_s8, %s1839_s20 }
  0x14   : > { %s205_s23 = scalar_select %p204_p11, %s1907_s12, 1  ;;  %vm596_vm0 = vcmask 146432   ;;  %vm693_vm1 = vcmask 1040384  }
  0x15   : > { %p1841_p13 = pnand %p1840_p12, %p1975_p4 }
  0x16   : > { %s1636_s24 = sshll.u32 %s205_s23, 8  ;;  %s1746_s25 = smul.u32 12, %s205_s23 }
  0x17   : > { %s1995_s28 = scalar_lea.vmem %s2189_s0, %s1636_s24  ;;  %p1842_p0 = pneg %p1841_p13 }
  0x18   : > { %s224_s3 = scalar_lea.vmem %s2190_s1, %s1746_s25  ;;  %v1807_v0 = vld [vmem:[%s1995_s28] sm:$0xff]   ;;  %v1809_v5 = vld [vmem:[%s1995_s28 + $0x8] sm:$0xff]   ;;  %v1811_v7 = vld [vmem:[%s1995_s28 + $0x10] sm:$0xff]   ;;  %s1917_s23 = smov [#allocation2]  }
  0x19   : > { %v1805_v1 = vld [vmem:[%s224_s3 + $0x8] ss:$0 sps:$4 sm:$0x11]   ;;  %v1806_v2 = vld [vmem:[%s224_s3] sm:$0xff]   ;;  %1676 = vmatprep.mubr.msk.bf16.mxu0 %vm596_vm0, %v1807_v0  ;;  %v1812_v8 = vld [vmem:[%s1995_s28 + $0x90] sm:$0xff]   ;;  %s1843_s24 = sshll.u32 %s1917_s23, 4  ;;  %s1844_s24 = int_to_ptr.vmem [resolvable:$false] %s1843_s24 }
  0x1a   : > { %1744 = vmatprep.subr.msk.bf16.mxu0 %vm693_vm1, %v1805_v1  ;;  %1745 = vmatprep.subr.msk.bf16.mxu1 %vm693_vm1, %v1805_v1  ;;  %v695_v3 = vsel %vm693_vm1, %v1805_v1, 0  ;;  %v1808_v4 = vld [vmem:[%s1995_s28 + $0x80] sm:$0xff]   ;;  %v1810_v6 = vld [vmem:[%s1995_s28 + $0x88] sm:$0xff]   ;;  %v1813_v9 = vld [vmem:[%s1995_s28 + $0x18] sm:$0xff]   ;;  %s1845_s25 = scalar_lea.vmem %s1844_s24, 16384  ;;  %p1846_p1 = scmp.lt.s32.totalorder %s2138_s8, %s1844_s24 }
  0x1b   : > { %1673 = vmatpush3.bf16.msra.mxu0 %v695_v3  ;;  %1742 = vmatpush3.bf16.msra.mxu1 %v695_v3  ;;  %v1814_v10 = vld [vmem:[%s1995_s28 + $0x98] sm:$0xff]   ;;  %v1815_v11 = vld [vmem:[%s1995_s28 + $0x20] sm:$0xff]   ;;  %v1817_v13 = vld [vmem:[%s1995_s28 + $0x28] sm:$0xff]   ;;  %p1847_p2 = scmp.lt.s32.totalorder %s1845_s25, %s1839_s20 }
  0x1c   : > { %1674 = vmatprep.subr.bf16.mxu0 %v1806_v2  ;;  %1741 = vmatprep.subr.bf16.mxu1 %v1806_v2  ;;  %v1816_v12 = vld [vmem:[%s1995_s28 + $0xa0] sm:$0xff]   ;;  %v1818_v14 = vld [vmem:[%s1995_s28 + $0xa8] sm:$0xff]   ;;  %v1819_v15 = vld [vmem:[%s1995_s28 + $0x30] sm:$0xff]  }
  0x1d   : > { %1708 = vmatprep.mubr.msk.bf16.mxu1 %vm596_vm0, %v1808_v4  ;;  %v1820_v16 = vld [vmem:[%s1995_s28 + $0xb0] sm:$0xff]   ;;  %v1821_v17 = vld [vmem:[%s1995_s28 + $0x38] sm:$0xff]   ;;  %v1823_v19 = vld [vmem:[%s1995_s28 + $0x40] sm:$0xff]   ;;  %p1848_p3 = por %p1847_p2, %p1846_p1 }
  0x1e   : > { %v1822_v18 = vld [vmem:[%s1995_s28 + $0xb8] sm:$0xff]   ;;  %v1824_v20 = vld [vmem:[%s1995_s28 + $0xc0] sm:$0xff]   ;;  %v1825_v21 = vld [vmem:[%s1995_s28 + $0x48] sm:$0xff]  }
  0x1f   : > { %1675 = vmatpush3.bf16.msra.mxu0 %v1806_v2  ;;  %1743 = vmatpush3.bf16.msra.mxu1 %v1806_v2  ;;  %v1826_v22 = vld [vmem:[%s1995_s28 + $0xc8] sm:$0xff]   ;;  %v1827_v23 = vld [vmem:[%s1995_s28 + $0x50] sm:$0xff]   ;;  %v1829_v25 = vld [vmem:[%s1995_s28 + $0x58] sm:$0xff]   ;;  %p1849_p5 = pnand %p1848_p3, %p1842_p0 }
  0x20   : > { %v1828_v24 = vld [vmem:[%s1995_s28 + $0xd0] sm:$0xff]   ;;  %v1830_v26 = vld [vmem:[%s1995_s28 + $0xd8] sm:$0xff]   ;;  %v1831_v27 = vld [vmem:[%s1995_s28 + $0x60] sm:$0xff]  }
  0x21   : > { %v1832_v28 = vld [vmem:[%s1995_s28 + $0xe0] sm:$0xff]   ;;  %v1833_v29 = vld [vmem:[%s1995_s28 + $0x68] sm:$0xff]   ;;  %v1835_v31 = vld [vmem:[%s1995_s28 + $0x70] sm:$0xff]  }
  0x22   : > { %1677 = vmatmul.mubr.msk.bf16.vlgmr.msra.gmra.mxu0 %vm596_vm0, %v1809_v5  ;;  %1709 = vmatmul.mubr.msk.bf16.vlgmr.msra.gmra.mxu1 %vm596_vm0, %v1810_v6  ;;  %v1834_v30 = vld [vmem:[%s1995_s28 + $0xe8] sm:$0xff]   ;;  %v1836_v32 = vld [vmem:[%s1995_s28 + $0xf0] sm:$0xff]   ;;  %v1837_v33 = vld [vmem:[%s1995_s28 + $0x78] sm:$0xff]  }
  0x23   : > { %1680 = vmatprep.mubr.msk.bf16.mxu0 %vm596_vm0, %v1811_v7  ;;  %1712 = vmatprep.mubr.msk.bf16.mxu1 %vm596_vm0, %v1812_v8  ;;  %v1838_v34 = vld [vmem:[%s1995_s28 + $0xf8] sm:$0xff]  }
  0x2a   : > { %1681 = vmatmul.mubr.msk.bf16.gmra.mxu0 %vm596_vm0, %v1813_v9  ;;  %1713 = vmatmul.mubr.msk.bf16.gmra.mxu1 %vm596_vm0, %v1814_v10 }
  0x2b   : > { %1684 = vmatprep.mubr.msk.bf16.mxu0 %vm596_vm0, %v1815_v11  ;;  %1716 = vmatprep.mubr.msk.bf16.mxu1 %vm596_vm0, %v1816_v12 }
  0x32   : > { %1685 = vmatmul.mubr.msk.bf16.gmra.mxu0 %vm596_vm0, %v1817_v13  ;;  %1717 = vmatmul.mubr.msk.bf16.gmra.mxu1 %vm596_vm0, %v1818_v14 }
  0x33   : > { %1688 = vmatprep.mubr.msk.bf16.mxu0 %vm596_vm0, %v1819_v15  ;;  %1720 = vmatprep.mubr.msk.bf16.mxu1 %vm596_vm0, %v1820_v16 }
  0x3a   : > { %1689 = vmatmul.mubr.msk.bf16.gmra.mxu0 %vm596_vm0, %v1821_v17  ;;  %1721 = vmatmul.mubr.msk.bf16.gmra.mxu1 %vm596_vm0, %v1822_v18 }
  0x3b   : > { %1692 = vmatprep.mubr.msk.bf16.mxu0 %vm596_vm0, %v1823_v19  ;;  %1724 = vmatprep.mubr.msk.bf16.mxu1 %vm596_vm0, %v1824_v20 }
  0x42   : > { %1693 = vmatmul.mubr.msk.bf16.gmra.mxu0 %vm596_vm0, %v1825_v21  ;;  %1725 = vmatmul.mubr.msk.bf16.gmra.mxu1 %vm596_vm0, %v1826_v22 }
  0x43   : > { %1696 = vmatprep.mubr.msk.bf16.mxu0 %vm596_vm0, %v1827_v23  ;;  %1728 = vmatprep.mubr.msk.bf16.mxu1 %vm596_vm0, %v1828_v24 }
  0x4a   : > { %1697 = vmatmul.mubr.msk.bf16.gmra.mxu0 %vm596_vm0, %v1829_v25  ;;  %1729 = vmatmul.mubr.msk.bf16.gmra.mxu1 %vm596_vm0, %v1830_v26 }
  0x4b   : > { %1700 = vmatprep.mubr.msk.bf16.mxu0 %vm596_vm0, %v1831_v27  ;;  %1732 = vmatprep.mubr.msk.bf16.mxu1 %vm596_vm0, %v1832_v28 }
  0x52   : > { %1701 = vmatmul.mubr.msk.bf16.gmra.mxu0 %vm596_vm0, %v1833_v29  ;;  %1733 = vmatmul.mubr.msk.bf16.gmra.mxu1 %vm596_vm0, %v1834_v30 }
  0x53   : > { %1704 = vmatprep.mubr.msk.bf16.mxu0 %vm596_vm0, %v1835_v31  ;;  %1736 = vmatprep.mubr.msk.bf16.mxu1 %vm596_vm0, %v1836_v32 }
  0x5a   : > { %1705 = vmatmul.mubr.msk.bf16.gmra.mxu0 %vm596_vm0, %v1837_v33  ;;  %1737 = vmatmul.mubr.msk.bf16.gmra.mxu1 %vm596_vm0, %v1838_v34 }
  0xe2   : > { %v1678_v35 = vpop.f32.mrf.mxu0  ;;  %v1710_v36 = vpop.f32.mrf.mxu1 }
  0xe3   : > { %vm1183_vm2 = vcmp.gt.f32.partialorder %v1678_v35, 0.0  ;;  %v1247_v39 = vmul.f32 0.1, %v1678_v35  ;;  %vm1215_vm3 = vcmp.gt.f32.partialorder %v1710_v36, 0.0  ;;  %v1279_v40 = vmul.f32 0.1, %v1710_v36 }
  0xe4   : > { %v731_v37 = vpop.f32.mrf.mxu0  ;;  %v859_v38 = vpop.f32.mrf.mxu1 }
  0xe5   : > { %v1311_v43 = vsel %vm1183_vm2, %v1678_v35, %v1247_v39  ;;  %v1343_v44 = vsel %vm1215_vm3, %v1710_v36, %v1279_v40  ;;  %vm1181_vm4 = vcmp.gt.f32.partialorder %v731_v37, 0.0  ;;  %v1245_v45 = vmul.f32 0.1, %v731_v37 }
  0xe6   : > { %v1679_v41 = vpop.f32.mrf.mxu0  ;;  %v1711_v42 = vpop.f32.mrf.mxu1  ;;  %1375 = vst [vmem:[%s2067_s6 + $0x10] sm:$0xff] %v1311_v43  ;;  %1407 = vst [vmem:[%s2067_s6 + $0x110] sm:$0xff] %v1343_v44  ;;  %vm1213_vm5 = vcmp.gt.f32.partialorder %v859_v38, 0.0  ;;  %v1277_v46 = vmul.f32 0.1, %v859_v38 }
  0xe7   : > { %vm1184_vm6 = vcmp.gt.f32.partialorder %v1679_v41, 0.0  ;;  %v1248_v49 = vmul.f32 0.1, %v1679_v41  ;;  %vm1216_vm7 = vcmp.gt.f32.partialorder %v1711_v42, 0.0  ;;  %v1280_v50 = vmul.f32 0.1, %v1711_v42 }
  0xe8   : > { %v734_v47 = vpop.f32.mrf.mxu0  ;;  %v862_v48 = vpop.f32.mrf.mxu1  ;;  %v1309_v51 = vsel %vm1181_vm4, %v731_v37, %v1245_v45  ;;  %v1341_v52 = vsel %vm1213_vm5, %v859_v38, %v1277_v46 }
  0xe9   : > { %1373 = vst [vmem:[%s2067_s6] sm:$0xff] %v1309_v51  ;;  %1405 = vst [vmem:[%s2067_s6 + $0x100] sm:$0xff] %v1341_v52  ;;  %v1312_v55 = vsel %vm1184_vm6, %v1679_v41, %v1248_v49  ;;  %v1344_v56 = vsel %vm1216_vm7, %v1711_v42, %v1280_v50  ;;  %vm1182_vm8 = vcmp.gt.f32.partialorder %v734_v47, 0.0  ;;  %v1246_v57 = vmul.f32 0.1, %v734_v47 }
  0xea   : > { %v1682_v53 = vpop.f32.mrf.mxu0  ;;  %v1714_v54 = vpop.f32.mrf.mxu1  ;;  %1376 = vst [vmem:[%s2067_s6 + $0x18] sm:$0xff] %v1312_v55  ;;  %1408 = vst [vmem:[%s2067_s6 + $0x118] sm:$0xff] %v1344_v56  ;;  %vm1214_vm9 = vcmp.gt.f32.partialorder %v862_v48, 0.0  ;;  %v1278_v58 = vmul.f32 0.1, %v862_v48 }
  0xeb   : > { %vm1187_vm10 = vcmp.gt.f32.partialorder %v1682_v53, 0.0  ;;  %v1251_v61 = vmul.f32 0.1, %v1682_v53  ;;  %vm1219_vm11 = vcmp.gt.f32.partialorder %v1714_v54, 0.0  ;;  %v1283_v62 = vmul.f32 0.1, %v1714_v54 }
  0xec   : > { %v747_v59 = vpop.f32.mrf.mxu0  ;;  %v875_v60 = vpop.f32.mrf.mxu1  ;;  %v1310_v63 = vsel %vm1182_vm8, %v734_v47, %v1246_v57  ;;  %v1342_v0 = vsel %vm1214_vm9, %v862_v48, %v1278_v58 }
  0xed   : > { %1374 = vst [vmem:[%s2067_s6 + $0x8] sm:$0xff] %v1310_v63  ;;  %1406 = vst [vmem:[%s2067_s6 + $0x108] sm:$0xff] %v1342_v0  ;;  %v1315_v3 = vsel %vm1187_vm10, %v1682_v53, %v1251_v61  ;;  %v1347_v4 = vsel %vm1219_vm11, %v1714_v54, %v1283_v62  ;;  %vm1185_vm12 = vcmp.gt.f32.partialorder %v747_v59, 0.0  ;;  %v1249_v5 = vmul.f32 0.1, %v747_v59 }
  0xee   : > { %v1683_v1 = vpop.f32.mrf.mxu0  ;;  %v1715_v2 = vpop.f32.mrf.mxu1  ;;  %1379 = vst [vmem:[%s2067_s6 + $0x30] sm:$0xff] %v1315_v3  ;;  %1411 = vst [vmem:[%s2067_s6 + $0x130] sm:$0xff] %v1347_v4  ;;  %vm1217_vm13 = vcmp.gt.f32.partialorder %v875_v60, 0.0  ;;  %v1281_v6 = vmul.f32 0.1, %v875_v60 }
  0xef   : > { %vm1188_vm14 = vcmp.gt.f32.partialorder %v1683_v1, 0.0  ;;  %v1252_v9 = vmul.f32 0.1, %v1683_v1  ;;  %vm1220_vm15 = vcmp.gt.f32.partialorder %v1715_v2, 0.0  ;;  %v1284_v10 = vmul.f32 0.1, %v1715_v2 }
  0xf0   : > { %v750_v7 = vpop.f32.mrf.mxu0  ;;  %v878_v8 = vpop.f32.mrf.mxu1  ;;  %v1313_v11 = vsel %vm1185_vm12, %v747_v59, %v1249_v5  ;;  %v1345_v12 = vsel %vm1217_vm13, %v875_v60, %v1281_v6 }
  0xf1   : > { %1377 = vst [vmem:[%s2067_s6 + $0x20] sm:$0xff] %v1313_v11  ;;  %1409 = vst [vmem:[%s2067_s6 + $0x120] sm:$0xff] %v1345_v12  ;;  %v1316_v15 = vsel %vm1188_vm14, %v1683_v1, %v1252_v9  ;;  %v1348_v16 = vsel %vm1220_vm15, %v1715_v2, %v1284_v10  ;;  %vm1186_vm0 = vcmp.gt.f32.partialorder %v750_v7, 0.0  ;;  %v1250_v17 = vmul.f32 0.1, %v750_v7 }
  0xf2   : > { %v1686_v13 = vpop.f32.mrf.mxu0  ;;  %v1718_v14 = vpop.f32.mrf.mxu1  ;;  %1380 = vst [vmem:[%s2067_s6 + $0x38] sm:$0xff] %v1316_v15  ;;  %1412 = vst [vmem:[%s2067_s6 + $0x138] sm:$0xff] %v1348_v16  ;;  %vm1218_vm1 = vcmp.gt.f32.partialorder %v878_v8, 0.0  ;;  %v1282_v18 = vmul.f32 0.1, %v878_v8 }
  0xf3   : > { %vm1191_vm2 = vcmp.gt.f32.partialorder %v1686_v13, 0.0  ;;  %v1255_v21 = vmul.f32 0.1, %v1686_v13  ;;  %vm1223_vm3 = vcmp.gt.f32.partialorder %v1718_v14, 0.0  ;;  %v1287_v22 = vmul.f32 0.1, %v1718_v14 }
  0xf4   : > { %v763_v19 = vpop.f32.mrf.mxu0  ;;  %v891_v20 = vpop.f32.mrf.mxu1  ;;  %v1314_v23 = vsel %vm1186_vm0, %v750_v7, %v1250_v17  ;;  %v1346_v24 = vsel %vm1218_vm1, %v878_v8, %v1282_v18 }
  0xf5   : > { %1378 = vst [vmem:[%s2067_s6 + $0x28] sm:$0xff] %v1314_v23  ;;  %1410 = vst [vmem:[%s2067_s6 + $0x128] sm:$0xff] %v1346_v24  ;;  %v1319_v27 = vsel %vm1191_vm2, %v1686_v13, %v1255_v21  ;;  %v1351_v28 = vsel %vm1223_vm3, %v1718_v14, %v1287_v22  ;;  %vm1189_vm4 = vcmp.gt.f32.partialorder %v763_v19, 0.0  ;;  %v1253_v29 = vmul.f32 0.1, %v763_v19 }
  0xf6   : > { %v1687_v25 = vpop.f32.mrf.mxu0  ;;  %v1719_v26 = vpop.f32.mrf.mxu1  ;;  %1383 = vst [vmem:[%s2067_s6 + $0x50] sm:$0xff] %v1319_v27  ;;  %1415 = vst [vmem:[%s2067_s6 + $0x150] sm:$0xff] %v1351_v28  ;;  %vm1221_vm5 = vcmp.gt.f32.partialorder %v891_v20, 0.0  ;;  %v1285_v30 = vmul.f32 0.1, %v891_v20 }
  0xf7   : > { %vm1192_vm6 = vcmp.gt.f32.partialorder %v1687_v25, 0.0  ;;  %v1256_v33 = vmul.f32 0.1, %v1687_v25  ;;  %vm1224_vm7 = vcmp.gt.f32.partialorder %v1719_v26, 0.0  ;;  %v1288_v34 = vmul.f32 0.1, %v1719_v26 }
  0xf8   : > { %v766_v31 = vpop.f32.mrf.mxu0  ;;  %v894_v32 = vpop.f32.mrf.mxu1  ;;  %v1317_v35 = vsel %vm1189_vm4, %v763_v19, %v1253_v29  ;;  %v1349_v36 = vsel %vm1221_vm5, %v891_v20, %v1285_v30 }
  0xf9   : > { %1381 = vst [vmem:[%s2067_s6 + $0x40] sm:$0xff] %v1317_v35  ;;  %1413 = vst [vmem:[%s2067_s6 + $0x140] sm:$0xff] %v1349_v36  ;;  %v1320_v39 = vsel %vm1192_vm6, %v1687_v25, %v1256_v33  ;;  %v1352_v40 = vsel %vm1224_vm7, %v1719_v26, %v1288_v34  ;;  %vm1190_vm8 = vcmp.gt.f32.partialorder %v766_v31, 0.0  ;;  %v1254_v41 = vmul.f32 0.1, %v766_v31 }
  0xfa   : > { %v1690_v37 = vpop.f32.mrf.mxu0  ;;  %v1722_v38 = vpop.f32.mrf.mxu1  ;;  %1384 = vst [vmem:[%s2067_s6 + $0x58] sm:$0xff] %v1320_v39  ;;  %1416 = vst [vmem:[%s2067_s6 + $0x158] sm:$0xff] %v1352_v40  ;;  %vm1222_vm9 = vcmp.gt.f32.partialorder %v894_v32, 0.0  ;;  %v1286_v42 = vmul.f32 0.1, %v894_v32 }
  0xfb   : > { %vm1195_vm10 = vcmp.gt.f32.partialorder %v1690_v37, 0.0  ;;  %v1259_v45 = vmul.f32 0.1, %v1690_v37  ;;  %vm1227_vm11 = vcmp.gt.f32.partialorder %v1722_v38, 0.0  ;;  %v1291_v46 = vmul.f32 0.1, %v1722_v38 }
  0xfc   : > { %v779_v43 = vpop.f32.mrf.mxu0  ;;  %v907_v44 = vpop.f32.mrf.mxu1  ;;  %v1318_v47 = vsel %vm1190_vm8, %v766_v31, %v1254_v41  ;;  %v1350_v48 = vsel %vm1222_vm9, %v894_v32, %v1286_v42 }
  0xfd   : > { %1382 = vst [vmem:[%s2067_s6 + $0x48] sm:$0xff] %v1318_v47  ;;  %1414 = vst [vmem:[%s2067_s6 + $0x148] sm:$0xff] %v1350_v48  ;;  %v1323_v51 = vsel %vm1195_vm10, %v1690_v37, %v1259_v45  ;;  %v1355_v52 = vsel %vm1227_vm11, %v1722_v38, %v1291_v46  ;;  %vm1193_vm12 = vcmp.gt.f32.partialorder %v779_v43, 0.0  ;;  %v1257_v53 = vmul.f32 0.1, %v779_v43 }
  0xfe   : > { %v1691_v49 = vpop.f32.mrf.mxu0  ;;  %v1723_v50 = vpop.f32.mrf.mxu1  ;;  %1387 = vst [vmem:[%s2067_s6 + $0x70] sm:$0xff] %v1323_v51  ;;  %1419 = vst [vmem:[%s2067_s6 + $0x170] sm:$0xff] %v1355_v52  ;;  %vm1225_vm13 = vcmp.gt.f32.partialorder %v907_v44, 0.0  ;;  %v1289_v54 = vmul.f32 0.1, %v907_v44 }
  0xff   : > { %vm1196_vm14 = vcmp.gt.f32.partialorder %v1691_v49, 0.0  ;;  %v1260_v57 = vmul.f32 0.1, %v1691_v49  ;;  %vm1228_vm15 = vcmp.gt.f32.partialorder %v1723_v50, 0.0  ;;  %v1292_v58 = vmul.f32 0.1, %v1723_v50 }
 0x100   : > { %v782_v55 = vpop.f32.mrf.mxu0  ;;  %v910_v56 = vpop.f32.mrf.mxu1  ;;  %v1321_v59 = vsel %vm1193_vm12, %v779_v43, %v1257_v53  ;;  %v1353_v60 = vsel %vm1225_vm13, %v907_v44, %v1289_v54 }
 0x101   : > { %1385 = vst [vmem:[%s2067_s6 + $0x60] sm:$0xff] %v1321_v59  ;;  %1417 = vst [vmem:[%s2067_s6 + $0x160] sm:$0xff] %v1353_v60  ;;  %v1324_v63 = vsel %vm1196_vm14, %v1691_v49, %v1260_v57  ;;  %v1356_v0 = vsel %vm1228_vm15, %v1723_v50, %v1292_v58  ;;  %vm1194_vm0 = vcmp.gt.f32.partialorder %v782_v55, 0.0  ;;  %v1258_v1 = vmul.f32 0.1, %v782_v55 }
 0x102   : > { %v1694_v61 = vpop.f32.mrf.mxu0  ;;  %v1726_v62 = vpop.f32.mrf.mxu1  ;;  %1388 = vst [vmem:[%s2067_s6 + $0x78] sm:$0xff] %v1324_v63  ;;  %1420 = vst [vmem:[%s2067_s6 + $0x178] sm:$0xff] %v1356_v0  ;;  %vm1226_vm1 = vcmp.gt.f32.partialorder %v910_v56, 0.0  ;;  %v1290_v2 = vmul.f32 0.1, %v910_v56 }
 0x103   : > { %vm1199_vm2 = vcmp.gt.f32.partialorder %v1694_v61, 0.0  ;;  %v1263_v5 = vmul.f32 0.1, %v1694_v61  ;;  %vm1231_vm3 = vcmp.gt.f32.partialorder %v1726_v62, 0.0  ;;  %v1295_v6 = vmul.f32 0.1, %v1726_v62 }
 0x104   : > { %v795_v3 = vpop.f32.mrf.mxu0  ;;  %v923_v4 = vpop.f32.mrf.mxu1  ;;  %v1322_v7 = vsel %vm1194_vm0, %v782_v55, %v1258_v1  ;;  %v1354_v8 = vsel %vm1226_vm1, %v910_v56, %v1290_v2 }
 0x105   : > { %1386 = vst [vmem:[%s2067_s6 + $0x68] sm:$0xff] %v1322_v7  ;;  %1418 = vst [vmem:[%s2067_s6 + $0x168] sm:$0xff] %v1354_v8  ;;  %v1327_v11 = vsel %vm1199_vm2, %v1694_v61, %v1263_v5  ;;  %v1359_v12 = vsel %vm1231_vm3, %v1726_v62, %v1295_v6  ;;  %vm1197_vm4 = vcmp.gt.f32.partialorder %v795_v3, 0.0  ;;  %v1261_v13 = vmul.f32 0.1, %v795_v3 }
 0x106   : > { %v1695_v9 = vpop.f32.mrf.mxu0  ;;  %v1727_v10 = vpop.f32.mrf.mxu1  ;;  %1391 = vst [vmem:[%s2067_s6 + $0x90] sm:$0xff] %v1327_v11  ;;  %1423 = vst [vmem:[%s2067_s6 + $0x190] sm:$0xff] %v1359_v12  ;;  %vm1229_vm5 = vcmp.gt.f32.partialorder %v923_v4, 0.0  ;;  %v1293_v14 = vmul.f32 0.1, %v923_v4 }
 0x107   : > { %vm1200_vm6 = vcmp.gt.f32.partialorder %v1695_v9, 0.0  ;;  %v1264_v17 = vmul.f32 0.1, %v1695_v9  ;;  %vm1232_vm7 = vcmp.gt.f32.partialorder %v1727_v10, 0.0  ;;  %v1296_v18 = vmul.f32 0.1, %v1727_v10 }
 0x108   : > { %v798_v15 = vpop.f32.mrf.mxu0  ;;  %v926_v16 = vpop.f32.mrf.mxu1  ;;  %v1325_v19 = vsel %vm1197_vm4, %v795_v3, %v1261_v13  ;;  %v1357_v20 = vsel %vm1229_vm5, %v923_v4, %v1293_v14 }
 0x109   : > { %1389 = vst [vmem:[%s2067_s6 + $0x80] sm:$0xff] %v1325_v19  ;;  %1421 = vst [vmem:[%s2067_s6 + $0x180] sm:$0xff] %v1357_v20  ;;  %v1328_v23 = vsel %vm1200_vm6, %v1695_v9, %v1264_v17  ;;  %v1360_v24 = vsel %vm1232_vm7, %v1727_v10, %v1296_v18  ;;  %vm1198_vm8 = vcmp.gt.f32.partialorder %v798_v15, 0.0  ;;  %v1262_v25 = vmul.f32 0.1, %v798_v15 }
 0x10a   : > { %v1698_v21 = vpop.f32.mrf.mxu0  ;;  %v1730_v22 = vpop.f32.mrf.mxu1  ;;  %1392 = vst [vmem:[%s2067_s6 + $0x98] sm:$0xff] %v1328_v23  ;;  %1424 = vst [vmem:[%s2067_s6 + $0x198] sm:$0xff] %v1360_v24  ;;  %vm1230_vm9 = vcmp.gt.f32.partialorder %v926_v16, 0.0  ;;  %v1294_v26 = vmul.f32 0.1, %v926_v16 }
 0x10b   : > { %vm1203_vm10 = vcmp.gt.f32.partialorder %v1698_v21, 0.0  ;;  %v1267_v29 = vmul.f32 0.1, %v1698_v21  ;;  %vm1235_vm11 = vcmp.gt.f32.partialorder %v1730_v22, 0.0  ;;  %v1299_v30 = vmul.f32 0.1, %v1730_v22 }
 0x10c   : > { %v811_v27 = vpop.f32.mrf.mxu0  ;;  %v939_v28 = vpop.f32.mrf.mxu1  ;;  %v1326_v31 = vsel %vm1198_vm8, %v798_v15, %v1262_v25  ;;  %v1358_v32 = vsel %vm1230_vm9, %v926_v16, %v1294_v26 }
 0x10d   : > { %1390 = vst [vmem:[%s2067_s6 + $0x88] sm:$0xff] %v1326_v31  ;;  %1422 = vst [vmem:[%s2067_s6 + $0x188] sm:$0xff] %v1358_v32  ;;  %v1331_v35 = vsel %vm1203_vm10, %v1698_v21, %v1267_v29  ;;  %v1363_v36 = vsel %vm1235_vm11, %v1730_v22, %v1299_v30  ;;  %vm1201_vm12 = vcmp.gt.f32.partialorder %v811_v27, 0.0  ;;  %v1265_v37 = vmul.f32 0.1, %v811_v27 }
 0x10e   : > { %v1699_v33 = vpop.f32.mrf.mxu0  ;;  %v1731_v34 = vpop.f32.mrf.mxu1  ;;  %1395 = vst [vmem:[%s2067_s6 + $0xb0] sm:$0xff] %v1331_v35  ;;  %1427 = vst [vmem:[%s2067_s6 + $0x1b0] sm:$0xff] %v1363_v36  ;;  %vm1233_vm13 = vcmp.gt.f32.partialorder %v939_v28, 0.0  ;;  %v1297_v38 = vmul.f32 0.1, %v939_v28 }
 0x10f   : > { %vm1204_vm14 = vcmp.gt.f32.partialorder %v1699_v33, 0.0  ;;  %v1268_v41 = vmul.f32 0.1, %v1699_v33  ;;  %vm1236_vm15 = vcmp.gt.f32.partialorder %v1731_v34, 0.0  ;;  %v1300_v42 = vmul.f32 0.1, %v1731_v34 }
 0x110   : > { %v814_v39 = vpop.f32.mrf.mxu0  ;;  %v942_v40 = vpop.f32.mrf.mxu1  ;;  %v1329_v43 = vsel %vm1201_vm12, %v811_v27, %v1265_v37  ;;  %v1361_v44 = vsel %vm1233_vm13, %v939_v28, %v1297_v38 }
 0x111   : > { %1393 = vst [vmem:[%s2067_s6 + $0xa0] sm:$0xff] %v1329_v43  ;;  %1425 = vst [vmem:[%s2067_s6 + $0x1a0] sm:$0xff] %v1361_v44  ;;  %v1332_v47 = vsel %vm1204_vm14, %v1699_v33, %v1268_v41  ;;  %v1364_v48 = vsel %vm1236_vm15, %v1731_v34, %v1300_v42  ;;  %vm1202_vm0 = vcmp.gt.f32.partialorder %v814_v39, 0.0  ;;  %v1266_v49 = vmul.f32 0.1, %v814_v39 }
 0x112   : > { %v1702_v45 = vpop.f32.mrf.mxu0  ;;  %v1734_v46 = vpop.f32.mrf.mxu1  ;;  %1396 = vst [vmem:[%s2067_s6 + $0xb8] sm:$0xff] %v1332_v47  ;;  %1428 = vst [vmem:[%s2067_s6 + $0x1b8] sm:$0xff] %v1364_v48  ;;  %vm1234_vm1 = vcmp.gt.f32.partialorder %v942_v40, 0.0  ;;  %v1298_v50 = vmul.f32 0.1, %v942_v40 }
 0x113   : > { %vm1207_vm2 = vcmp.gt.f32.partialorder %v1702_v45, 0.0  ;;  %v1271_v53 = vmul.f32 0.1, %v1702_v45  ;;  %vm1239_vm3 = vcmp.gt.f32.partialorder %v1734_v46, 0.0  ;;  %v1303_v54 = vmul.f32 0.1, %v1734_v46 }
 0x114   : > { %v827_v51 = vpop.f32.mrf.mxu0  ;;  %v955_v52 = vpop.f32.mrf.mxu1  ;;  %v1330_v55 = vsel %vm1202_vm0, %v814_v39, %v1266_v49  ;;  %v1362_v56 = vsel %vm1234_vm1, %v942_v40, %v1298_v50 }
 0x115   : > { %1394 = vst [vmem:[%s2067_s6 + $0xa8] sm:$0xff] %v1330_v55  ;;  %1426 = vst [vmem:[%s2067_s6 + $0x1a8] sm:$0xff] %v1362_v56  ;;  %v1335_v59 = vsel %vm1207_vm2, %v1702_v45, %v1271_v53  ;;  %v1367_v60 = vsel %vm1239_vm3, %v1734_v46, %v1303_v54  ;;  %vm1205_vm4 = vcmp.gt.f32.partialorder %v827_v51, 0.0  ;;  %v1269_v61 = vmul.f32 0.1, %v827_v51 }
 0x116   : > { %v1703_v57 = vpop.f32.mrf.mxu0  ;;  %v1735_v58 = vpop.f32.mrf.mxu1  ;;  %1399 = vst [vmem:[%s2067_s6 + $0xd0] sm:$0xff] %v1335_v59  ;;  %1431 = vst [vmem:[%s2067_s6 + $0x1d0] sm:$0xff] %v1367_v60  ;;  %vm1237_vm5 = vcmp.gt.f32.partialorder %v955_v52, 0.0  ;;  %v1301_v62 = vmul.f32 0.1, %v955_v52 }
 0x117   : > { %vm1208_vm6 = vcmp.gt.f32.partialorder %v1703_v57, 0.0  ;;  %v1272_v1 = vmul.f32 0.1, %v1703_v57  ;;  %vm1240_vm7 = vcmp.gt.f32.partialorder %v1735_v58, 0.0  ;;  %v1304_v2 = vmul.f32 0.1, %v1735_v58 }
 0x118   : > { %v830_v63 = vpop.f32.mrf.mxu0  ;;  %v958_v0 = vpop.f32.mrf.mxu1  ;;  %v1333_v3 = vsel %vm1205_vm4, %v827_v51, %v1269_v61  ;;  %v1365_v4 = vsel %vm1237_vm5, %v955_v52, %v1301_v62 }
 0x119   : > { %1397 = vst [vmem:[%s2067_s6 + $0xc0] sm:$0xff] %v1333_v3  ;;  %1429 = vst [vmem:[%s2067_s6 + $0x1c0] sm:$0xff] %v1365_v4  ;;  %v1336_v7 = vsel %vm1208_vm6, %v1703_v57, %v1272_v1  ;;  %v1368_v8 = vsel %vm1240_vm7, %v1735_v58, %v1304_v2  ;;  %vm1206_vm8 = vcmp.gt.f32.partialorder %v830_v63, 0.0  ;;  %v1270_v9 = vmul.f32 0.1, %v830_v63 }
 0x11a   : > { %v1706_v5 = vpop.f32.mrf.mxu0  ;;  %v1738_v6 = vpop.f32.mrf.mxu1  ;;  %1400 = vst [vmem:[%s2067_s6 + $0xd8] sm:$0xff] %v1336_v7  ;;  %1432 = vst [vmem:[%s2067_s6 + $0x1d8] sm:$0xff] %v1368_v8  ;;  %vm1238_vm9 = vcmp.gt.f32.partialorder %v958_v0, 0.0  ;;  %v1302_v10 = vmul.f32 0.1, %v958_v0 }
 0x11b   : > { %vm1211_vm10 = vcmp.gt.f32.partialorder %v1706_v5, 0.0  ;;  %v1275_v13 = vmul.f32 0.1, %v1706_v5  ;;  %vm1243_vm11 = vcmp.gt.f32.partialorder %v1738_v6, 0.0  ;;  %v1307_v14 = vmul.f32 0.1, %v1738_v6 }
 0x11c   : > { %v843_v11 = vpop.f32.mrf.mxu0  ;;  %v971_v12 = vpop.f32.mrf.mxu1  ;;  %v1334_v15 = vsel %vm1206_vm8, %v830_v63, %v1270_v9  ;;  %v1366_v16 = vsel %vm1238_vm9, %v958_v0, %v1302_v10 }
 0x11d   : > { %1398 = vst [vmem:[%s2067_s6 + $0xc8] sm:$0xff] %v1334_v15  ;;  %1430 = vst [vmem:[%s2067_s6 + $0x1c8] sm:$0xff] %v1366_v16  ;;  %v1339_v19 = vsel %vm1211_vm10, %v1706_v5, %v1275_v13  ;;  %v1371_v20 = vsel %vm1243_vm11, %v1738_v6, %v1307_v14  ;;  %vm1209_vm12 = vcmp.gt.f32.partialorder %v843_v11, 0.0  ;;  %v1273_v21 = vmul.f32 0.1, %v843_v11 }
 0x11e   : > { %v1707_v17 = vpop.f32.mrf.mxu0  ;;  %v1739_v18 = vpop.f32.mrf.mxu1  ;;  %1403 = vst [vmem:[%s2067_s6 + $0xf0] sm:$0xff] %v1339_v19  ;;  %1435 = vst [vmem:[%s2067_s6 + $0x1f0] sm:$0xff] %v1371_v20  ;;  %vm1241_vm13 = vcmp.gt.f32.partialorder %v971_v12, 0.0  ;;  %v1305_v22 = vmul.f32 0.1, %v971_v12 }
 0x11f   : > { %vm1212_vm14 = vcmp.gt.f32.partialorder %v1707_v17, 0.0  ;;  %v1276_v25 = vmul.f32 0.1, %v1707_v17  ;;  %vm1244_vm15 = vcmp.gt.f32.partialorder %v1739_v18, 0.0  ;;  %v1308_v26 = vmul.f32 0.1, %v1739_v18 }
 0x120   : > { %v846_v23 = vpop.f32.mrf.mxu0  ;;  %v974_v24 = vpop.f32.mrf.mxu1  ;;  %v1337_v27 = vsel %vm1209_vm12, %v843_v11, %v1273_v21  ;;  %v1369_v28 = vsel %vm1241_vm13, %v971_v12, %v1305_v22 }
 0x121   : > { %1401 = vst [vmem:[%s2067_s6 + $0xe0] sm:$0xff] %v1337_v27  ;;  %1433 = vst [vmem:[%s2067_s6 + $0x1e0] sm:$0xff] %v1369_v28  ;;  %v1340_v29 = vsel %vm1212_vm14, %v1707_v17, %v1276_v25  ;;  %v1372_v30 = vsel %vm1244_vm15, %v1739_v18, %v1308_v26  ;;  %vm1210_vm0 = vcmp.gt.f32.partialorder %v846_v23, 0.0  ;;  %v1274_v31 = vmul.f32 0.1, %v846_v23 }
 0x122   : > { %1404 = vst [vmem:[%s2067_s6 + $0xf8] sm:$0xff] %v1340_v29  ;;  %1436 = vst [vmem:[%s2067_s6 + $0x1f8] sm:$0xff] %v1372_v30  ;;  %vm1242_vm1 = vcmp.gt.f32.partialorder %v974_v24, 0.0  ;;  %v1306_v32 = vmul.f32 0.1, %v974_v24 }
 0x123   : > { %v1338_v33 = vsel %vm1210_vm0, %v846_v23, %v1274_v31 }
 0x124   : > { %v1370_v34 = vsel %vm1242_vm1, %v974_v24, %v1306_v32  ;;  %1402 = vst [vmem:[%s2067_s6 + $0xe8] sm:$0xff] %v1338_v33 }
 0x125   : > { %1434 = vst [vmem:[%s2067_s6 + $0x1e8] sm:$0xff] %v1370_v34 }
 0x126   : > { %1852 = shalt.err (!%p1849_p5)
}
 0x127   : > { %s1853_s26 = scalar_lea.hbm %s2136_s16, 8192  ;;  %s1857_s29 = scalar_lea.hbm %s2191_s2, 16384 }
 0x128   : > { %p1854_p6 = scmp.ne.s32.totalorder %s2136_s16, %s1853_s26  ;;  %p1858_p10 = scmp.lt.s32.totalorder %s2136_s16, %s2191_s2 }
 0x129   : > { %p1859_p11 = scmp.lt.s32.totalorder %s1857_s29, %s1853_s26 }
 0x12a   : > { %p1855_p7 = pnand %p1854_p6, %p1975_p4 }
 0x12b   : > { %p1860_p12 = por %p1859_p11, %p1858_p10 }
 0x12c   : > { %p1856_p9 = pneg %p1855_p7 }
 0x12e   : > { %p1861_p13 = pnand %p1860_p12, %p1856_p9 }
 0x130   : > { %1864 = shalt.err (!%p1861_p13)
}
 0x131   : > { %s1918_s4 = smov 128   ;;  %s1919_s5 = smov 8  }
 0x132   : > { %1747 = dma.vmem_to_hbm [thread:$0]  (%p1975_p4), %s2138_s8, 8192, %s2136_s16, %s2144_s18, %s1918_s4, %s1918_s4, %s1919_s5  }
 0x133 PF: > { %p1753_p0 = scmp.ge.s32.totalorder %s1915_s14, 2  ;;  %s1468_s6 = sand.u32 1, %s1895_s9  }
 0x134   : > { %s1469_s7 = scalar_lea.sflag [#allocation3], %s1468_s6 }
 0x135   : > { %p1750_p1 = pnand %p1753_p0, %p1982_p8 }
 0x137   : > { %p1751_p2 = pneg %p1750_p1 }
 0x139   : > { %1890 = dma.done.wait (%p1751_p2), %s1469_s7, 8192  }
 0x13a   : > { %1892 = vsyncadd (%p1751_p2), %s1469_s7, 4294959104  ;;  %s15_s14 = sadd.s32 1, %s1915_s14   ;;  %s2194_s9 = smov %s1899_s10 }
 0x13b   : > { %p12_p3 = scmp.ge.s32.totalorder %s15_s14, 4   ;;  %s2195_s10 = smov %s1903_s11 }
 0x13c   : > { %s2196_s11 = smov %s1988_s22  ;;  %s2197_s12 = smov %s1911_s13 }
 0x13d   : > { %s2198_s13 = smov %s2200_s17  ;;  %14 = sbr.rel (!%p12_p3) target bundleno = 4 (0x4), region = 74 }
 0x142   :  { %1474 = vsyncpa [#allocation3], 1 }
 0x143   :  { %1476 = vsyncpa [#allocation3 + $0x1], 1 }

</bundles_post_ra>
